<compile_context>
chip_gen: v7x
topology: tpu7x:2x2x1
jax: 0.10.0
libtpu: 0.0.40
codegen_flags: <defaults>
</compile_context>

<pallas_src>
import math

import jax
import jax.numpy as jnp
from jax import lax
from jax.experimental import pallas as pl
from jax.experimental.pallas import tpu as pltpu

H = 20   # hidden_size (valid lanes per gate)
I = 2    # input_size
GP = 32  # padded gate stripe width (4 * GP = 128 lanes = one vreg row)


def lstm_lr_kernel(x_ref, wih_ref, whh_ref, b_ref, fcw_ref, fcb_ref,
                   out_ref, xproj_scr, hs_scr):
    # x_ref:   (N, 2)          wih_ref: (2, 128)     whh_ref: (32, 128)
    # b_ref:   (1, 128)        fcw_ref: (1, 32)      fcb_ref: (1, 1)
    # out_ref: (1, N)          xproj_scr: (N, 128)   hs_scr: (N, 32)
    n = x_ref.shape[0]

    # (1) Input projection + combined bias for the whole sequence: one batched matmul.
    #     Padding lanes of each 32-lane gate stripe are exactly zero (zero weight cols/bias).
    xproj_scr[...] = (
        jnp.dot(x_ref[...], wih_ref[...], preferred_element_type=jnp.float32)
        + b_ref[...])

    # Loop-invariant recurrent weights: load once, keep in vregs across the unrolled loop.
    whh = whh_ref[...]  # (32, 128)

    # (2) Recurrence: one fused MXU matmul per step; h/c live in registers as (1, 32)
    #     vectors (lanes 20..31 stay zero: pre_pad = 0 -> sigmoid 0.5 / tanh 0 ->
    #     c_pad = 0.5*c_pad + 0.5*0 = 0, h_pad = 0.5*tanh(0) = 0).
    def step(t, carry):
        h_prev, c_prev = carry                                         # (1, 32) each
        pre = xproj_scr[pl.ds(t, 1), :] + jnp.dot(
            h_prev, whh, preferred_element_type=jnp.float32)           # (1, 128)

        # Full-vreg EUP pushes; select gate lanes afterwards (gate order i, f, o, g).
        sig = jax.nn.sigmoid(pre)                                      # (1, 128)
        th = jnp.tanh(pre)                                             # (1, 128)
        i_g = sig[:, 0 * GP:1 * GP]
        f_g = sig[:, 1 * GP:2 * GP]
        o_g = sig[:, 2 * GP:3 * GP]
        g_g = th[:, 3 * GP:4 * GP]

        c_new = f_g * c_prev + i_g * g_g
        h_new = o_g * jnp.tanh(c_new)
        hs_scr[pl.ds(t, 1), :] = h_new                                 # write-only store
        return (h_new, c_new)

    h0 = jnp.zeros((1, GP), jnp.float32)
    c0 = jnp.zeros((1, GP), jnp.float32)
    lax.fori_loop(0, n, step, (h0, c0), unroll=True)

    # (3) FC projection once, outside the recurrence; lane-dense (1, N) store.
    out_ref[...] = (
        jnp.dot(fcw_ref[...], hs_scr[...].T, preferred_element_type=jnp.float32)
        + fcb_ref[...])


def learning_rate_learner(momentum, new_gradients, params):
    x = jnp.stack([momentum, new_gradients], axis=1).astype(jnp.float32)  # (N, 2)
    N = x.shape[0]
    vmem = pl.BlockSpec(memory_space=pltpu.MemorySpace.VMEM)

    flops = 2 * N * (I * 4 * GP + GP * 4 * GP + GP)          # in-proj + recurrence + fc
    transcendentals = 3 * N * 4 * GP                          # sigmoid + tanh(pre) + tanh(c)
    bytes_accessed = 4 * (N * I + I * 4 * GP + GP * 4 * GP + 4 * GP + GP + 1 + N)

    out_row = pl.pallas_call(
        lstm_lr_kernel,
        out_shape=jax.ShapeDtypeStruct((1, N), jnp.float32),
        in_specs=[vmem] * 6,
        out_specs=vmem,
        scratch_shapes=[pltpu.VMEM((N, 4 * GP), jnp.float32),   # xproj
                        pltpu.VMEM((N, GP), jnp.float32)],      # hidden states
        cost_estimate=pl.CostEstimate(flops=flops,
                                      transcendentals=transcendentals,
                                      bytes_accessed=bytes_accessed),
    )(x, params["w_ih"], params["w_hh"], params["b"],
      params["fc_w"], params["fc_b"])
    return out_row.reshape(N, 1)


def init_params(key):
    """Deterministic synthetic init matching the PyTorch shapes/init scheme.

    nn.LSTM params (gate order i, f, g, o along the 4H axis):
      weight_ih_l0 (4H, 2) xavier, weight_hh_l0 (4H, H) xavier,
      bias_ih_l0 / bias_hh_l0 both constant -1.0.
    fc: weight (1, H) xavier, bias 0.

    Returns (torch_layout_params, fused_kernel_params). The fused layout pre-transposes to
    right-multiply form, reorders gates to (i, f, o, g), and zero-pads each gate's output
    lanes from 20 to a 32-lane stripe (4 x 32 = 128 lanes total).
    """
    k1, k2, k3 = jax.random.split(key, 3)

    b_ih_bound = math.sqrt(6.0 / (4 * H + I))
    w_ih_t = jax.random.uniform(k1, (4 * H, I), jnp.float32, -b_ih_bound, b_ih_bound)
    b_hh_bound = math.sqrt(6.0 / (4 * H + H))
    w_hh_t = jax.random.uniform(k2, (4 * H, H), jnp.float32, -b_hh_bound, b_hh_bound)
    bias_ih = jnp.full((4 * H,), -1.0, jnp.float32)
    bias_hh = jnp.full((4 * H,), -1.0, jnp.float32)

    fc_bound = math.sqrt(6.0 / (1 + H))
    fc_w_t = jax.random.uniform(k3, (1, H), jnp.float32, -fc_bound, fc_bound)
    fc_b_t = jnp.zeros((1,), jnp.float32)

    torch_params = dict(w_ih=w_ih_t, w_hh=w_hh_t, b_ih=bias_ih, b_hh=bias_hh,
                        fc_w=fc_w_t, fc_b=fc_b_t)

    # Fused/padded kernel layout.
    perm = (0, 1, 3, 2)   # torch (i, f, g, o) -> kernel stripes (i, f, o, g)

    def fuse_pad_cols(w_t):               # (4H, K) torch layout -> (K, 4*GP) right-multiply
        K = w_t.shape[1]
        out = jnp.zeros((K, 4 * GP), jnp.float32)
        for dst, src in enumerate(perm):
            out = out.at[:, dst * GP: dst * GP + H].set(w_t[src * H:(src + 1) * H, :].T)
        return out

    wih_p = fuse_pad_cols(w_ih_t)                                               # (2, 128)
    whh_p = jnp.zeros((GP, 4 * GP), jnp.float32).at[:H, :].set(fuse_pad_cols(w_hh_t))  # (32, 128)

    b_sum = bias_ih + bias_hh
    b_p = jnp.zeros((1, 4 * GP), jnp.float32)
    for dst, src in enumerate(perm):
        b_p = b_p.at[0, dst * GP: dst * GP + H].set(b_sum[src * H:(src + 1) * H])

    fcw_p = jnp.zeros((1, GP), jnp.float32).at[:, :H].set(fc_w_t)               # (1, 32)

    fused_params = dict(w_ih=wih_p, w_hh=whh_p, b=b_p,
                        fc_w=fcw_p, fc_b=fc_b_t.reshape(1, 1))
    return torch_params, fused_params


def reference(momentum, new_gradients, p):
    """Pure-JAX reference implementing the PyTorch LSTM equations (gate order i,f,g,o)
    directly on the torch-layout parameters."""
    x = jnp.stack([momentum, new_gradients], axis=1).astype(jnp.float32)  # (N, 2)
    w_ih, w_hh = p["w_ih"], p["w_hh"]            # (4H, I), (4H, H)
    b = p["b_ih"] + p["b_hh"]                    # (4H,)

    def step(carry, x_t):
        h, c = carry
        z = w_ih @ x_t + w_hh @ h + b            # (4H,)
        i = jax.nn.sigmoid(z[0:H])
        f = jax.nn.sigmoid(z[H:2 * H])
        g = jnp.tanh(z[2 * H:3 * H])
        o = jax.nn.sigmoid(z[3 * H:4 * H])
        c = f * c + i * g
        h = o * jnp.tanh(c)
        return (h, c), h

    init = (jnp.zeros((H,), jnp.float32), jnp.zeros((H,), jnp.float32))
    _, hs = lax.scan(step, init, x)              # (N, H)
    return hs @ p["fc_w"].T + p["fc_b"]          # (N, 1)


if __name__ == "__main__":
    key = jax.random.PRNGKey(0)
    pk, mk, gk = jax.random.split(key, 3)

    torch_params, fused_params = init_params(pk)

    N = 8  # number of (momentum, gradient) pairs -> LSTM sequence length
    momentum = jax.random.normal(mk, (N,), jnp.float32)
    new_gradients = jax.random.normal(gk, (N,), jnp.float32)

    out = learning_rate_learner(momentum, new_gradients, fused_params)
    out = jax.block_until_ready(out)

    ref = jax.block_until_ready(reference(momentum, new_gradients, torch_params))
    assert out.shape == (N, 1)
    assert jnp.allclose(out, ref, atol=1e-4, rtol=1e-4), (out, ref)

    print("KERNEL_OK")
</pallas_src>

<mosaic_0001>
module attributes {stable_mosaic.version = 11 : i64} {
  func.func @lstm_lr_kernel(%arg0: memref<8x2xf32, #tpu.memory_space<vmem>>, %arg1: memref<2x128xf32, #tpu.memory_space<vmem>>, %arg2: memref<32x128xf32, #tpu.memory_space<vmem>>, %arg3: memref<1x128xf32, #tpu.memory_space<vmem>>, %arg4: memref<1x32xf32, #tpu.memory_space<vmem>>, %arg5: memref<1x1xf32, #tpu.memory_space<vmem>>, %arg6: memref<1x8xf32, #tpu.memory_space<vmem>>, %arg7: memref<8x128xf32, #tpu.memory_space<vmem>>, %arg8: memref<8x32xf32, #tpu.memory_space<vmem>>) attributes {dimension_semantics = [], scalar_prefetch = 0 : i64, scratch_operands = 2 : i64, tpu.core_type = #tpu.core_type<tc>} {
    %c0 = arith.constant 0 : index
    %c0_0 = arith.constant 0 : index
    %0 = vector.load %arg0[%c0, %c0_0] : memref<8x2xf32, #tpu.memory_space<vmem>>, vector<8x2xf32>
    %c0_1 = arith.constant 0 : index
    %c0_2 = arith.constant 0 : index
    %1 = vector.load %arg1[%c0_1, %c0_2] : memref<2x128xf32, #tpu.memory_space<vmem>>, vector<2x128xf32>
    %cst = arith.constant dense<0.000000e+00> : vector<8x128xf32>
    %2 = tpu.matmul %0, %1, %cst {dimension_numbers = #tpu.dot_dimension_numbers<[1], [0], [0], [1], [0, 0, 1, 1], [], []>} : vector<8x2xf32>, vector<2x128xf32>, vector<8x128xf32> -> vector<8x128xf32>
    %c0_3 = arith.constant 0 : index
    %c0_4 = arith.constant 0 : index
    %3 = vector.load %arg3[%c0_3, %c0_4] : memref<1x128xf32, #tpu.memory_space<vmem>>, vector<1x128xf32>
    %4 = vector.broadcast %3 : vector<1x128xf32> to vector<8x128xf32>
    %5 = arith.addf %2, %4 : vector<8x128xf32>
    %c0_5 = arith.constant 0 : index
    %c0_6 = arith.constant 0 : index
    %6 = vector.load %arg7[%c0_5, %c0_6] : memref<8x128xf32, #tpu.memory_space<vmem>>, vector<8x128xf32>
    tpu.vector_store %arg7[%c0_5, %c0_6], %5 {strides = array<i32>} : memref<8x128xf32, #tpu.memory_space<vmem>>, vector<8x128xf32>,
    %c0_7 = arith.constant 0 : index
    %c0_8 = arith.constant 0 : index
    %7 = vector.load %arg2[%c0_7, %c0_8] : memref<32x128xf32, #tpu.memory_space<vmem>>, vector<32x128xf32>
    %cst_9 = arith.constant 0.000000e+00 : f32
    %8 = vector.broadcast %cst_9 : f32 to vector<1x32xf32>
    %cst_10 = arith.constant 0.000000e+00 : f32
    %9 = vector.broadcast %cst_10 : f32 to vector<1x32xf32>
    %c0_i32 = arith.constant 0 : i32
    %10 = arith.index_cast %c0_i32 : i32 to index
    %c0_11 = arith.constant 0 : index
    %11 = vector.load %arg7[%10, %c0_11] : memref<8x128xf32, #tpu.memory_space<vmem>>, vector<1x128xf32>
    %cst_12 = arith.constant dense<0.000000e+00> : vector<1x128xf32>
    %12 = tpu.matmul %8, %7, %cst_12 {dimension_numbers = #tpu.dot_dimension_numbers<[1], [0], [0], [1], [0, 0, 1, 1], [], []>} : vector<1x32xf32>, vector<32x128xf32>, vector<1x128xf32> -> vector<1x128xf32>
    %13 = arith.addf %11, %12 : vector<1x128xf32>
    %14 = arith.negf %13 : vector<1x128xf32>
    %15 = math.exp %14 : vector<1x128xf32>
    %cst_13 = arith.constant 1.000000e+00 : f32
    %16 = vector.broadcast %cst_13 : f32 to vector<1x128xf32>
    %17 = arith.addf %16, %15 : vector<1x128xf32>
    %18 = arith.divf %16, %17 : vector<1x128xf32>
    %19 = math.tanh %13 : vector<1x128xf32>
    %20 = vector.extract_strided_slice %18 {offsets = [0, 0], sizes = [1, 32], strides = [1, 1]} : vector<1x128xf32> to vector<1x32xf32>
    %21 = vector.extract_strided_slice %18 {offsets = [0, 32], sizes = [1, 32], strides = [1, 1]} : vector<1x128xf32> to vector<1x32xf32>
    %22 = vector.extract_strided_slice %18 {offsets = [0, 64], sizes = [1, 32], strides = [1, 1]} : vector<1x128xf32> to vector<1x32xf32>
    %23 = vector.extract_strided_slice %19 {offsets = [0, 96], sizes = [1, 32], strides = [1, 1]} : vector<1x128xf32> to vector<1x32xf32>
    %24 = arith.mulf %21, %9 : vector<1x32xf32>
    %25 = arith.mulf %20, %23 : vector<1x32xf32>
    %26 = arith.addf %24, %25 : vector<1x32xf32>
    %27 = math.tanh %26 : vector<1x32xf32>
    %28 = arith.mulf %22, %27 : vector<1x32xf32>
    %29 = arith.index_cast %c0_i32 : i32 to index
    %c0_14 = arith.constant 0 : index
    %30 = vector.load %arg8[%29, %c0_14] : memref<8x32xf32, #tpu.memory_space<vmem>>, vector<1x32xf32>
    tpu.vector_store %arg8[%29, %c0_14], %28 {strides = array<i32>} : memref<8x32xf32, #tpu.memory_space<vmem>>, vector<1x32xf32>,
    %c1_i32 = arith.constant 1 : i32
    %31 = arith.index_cast %c1_i32 : i32 to index
    %c0_15 = arith.constant 0 : index
    %32 = vector.load %arg7[%31, %c0_15] : memref<8x128xf32, #tpu.memory_space<vmem>>, vector<1x128xf32>
    %cst_16 = arith.constant dense<0.000000e+00> : vector<1x128xf32>
    %33 = tpu.matmul %28, %7, %cst_16 {dimension_numbers = #tpu.dot_dimension_numbers<[1], [0], [0], [1], [0, 0, 1, 1], [], []>} : vector<1x32xf32>, vector<32x128xf32>, vector<1x128xf32> -> vector<1x128xf32>
    %34 = arith.addf %32, %33 : vector<1x128xf32>
    %35 = arith.negf %34 : vector<1x128xf32>
    %36 = math.exp %35 : vector<1x128xf32>
    %cst_17 = arith.constant 1.000000e+00 : f32
    %37 = vector.broadcast %cst_17 : f32 to vector<1x128xf32>
    %38 = arith.addf %37, %36 : vector<1x128xf32>
    %39 = arith.divf %37, %38 : vector<1x128xf32>
    %40 = math.tanh %34 : vector<1x128xf32>
    %41 = vector.extract_strided_slice %39 {offsets = [0, 0], sizes = [1, 32], strides = [1, 1]} : vector<1x128xf32> to vector<1x32xf32>
    %42 = vector.extract_strided_slice %39 {offsets = [0, 32], sizes = [1, 32], strides = [1, 1]} : vector<1x128xf32> to vector<1x32xf32>
    %43 = vector.extract_strided_slice %39 {offsets = [0, 64], sizes = [1, 32], strides = [1, 1]} : vector<1x128xf32> to vector<1x32xf32>
    %44 = vector.extract_strided_slice %40 {offsets = [0, 96], sizes = [1, 32], strides = [1, 1]} : vector<1x128xf32> to vector<1x32xf32>
    %45 = arith.mulf %42, %26 : vector<1x32xf32>
    %46 = arith.mulf %41, %44 : vector<1x32xf32>
    %47 = arith.addf %45, %46 : vector<1x32xf32>
    %48 = math.tanh %47 : vector<1x32xf32>
    %49 = arith.mulf %43, %48 : vector<1x32xf32>
    %50 = arith.index_cast %c1_i32 : i32 to index
    %c0_18 = arith.constant 0 : index
    %51 = vector.load %arg8[%50, %c0_18] : memref<8x32xf32, #tpu.memory_space<vmem>>, vector<1x32xf32>
    tpu.vector_store %arg8[%50, %c0_18], %49 {strides = array<i32>} : memref<8x32xf32, #tpu.memory_space<vmem>>, vector<1x32xf32>,
    %c2_i32 = arith.constant 2 : i32
    %52 = arith.index_cast %c2_i32 : i32 to index
    %c0_19 = arith.constant 0 : index
    %53 = vector.load %arg7[%52, %c0_19] : memref<8x128xf32, #tpu.memory_space<vmem>>, vector<1x128xf32>
    %cst_20 = arith.constant dense<0.000000e+00> : vector<1x128xf32>
    %54 = tpu.matmul %49, %7, %cst_20 {dimension_numbers = #tpu.dot_dimension_numbers<[1], [0], [0], [1], [0, 0, 1, 1], [], []>} : vector<1x32xf32>, vector<32x128xf32>, vector<1x128xf32> -> vector<1x128xf32>
    %55 = arith.addf %53, %54 : vector<1x128xf32>
    %56 = arith.negf %55 : vector<1x128xf32>
    %57 = math.exp %56 : vector<1x128xf32>
    %cst_21 = arith.constant 1.000000e+00 : f32
    %58 = vector.broadcast %cst_21 : f32 to vector<1x128xf32>
    %59 = arith.addf %58, %57 : vector<1x128xf32>
    %60 = arith.divf %58, %59 : vector<1x128xf32>
    %61 = math.tanh %55 : vector<1x128xf32>
    %62 = vector.extract_strided_slice %60 {offsets = [0, 0], sizes = [1, 32], strides = [1, 1]} : vector<1x128xf32> to vector<1x32xf32>
    %63 = vector.extract_strided_slice %60 {offsets = [0, 32], sizes = [1, 32], strides = [1, 1]} : vector<1x128xf32> to vector<1x32xf32>
    %64 = vector.extract_strided_slice %60 {offsets = [0, 64], sizes = [1, 32], strides = [1, 1]} : vector<1x128xf32> to vector<1x32xf32>
    %65 = vector.extract_strided_slice %61 {offsets = [0, 96], sizes = [1, 32], strides = [1, 1]} : vector<1x128xf32> to vector<1x32xf32>
    %66 = arith.mulf %63, %47 : vector<1x32xf32>
    %67 = arith.mulf %62, %65 : vector<1x32xf32>
    %68 = arith.addf %66, %67 : vector<1x32xf32>
    %69 = math.tanh %68 : vector<1x32xf32>
    %70 = arith.mulf %64, %69 : vector<1x32xf32>
    %71 = arith.index_cast %c2_i32 : i32 to index
    %c0_22 = arith.constant 0 : index
    %72 = vector.load %arg8[%71, %c0_22] : memref<8x32xf32, #tpu.memory_space<vmem>>, vector<1x32xf32>
    tpu.vector_store %arg8[%71, %c0_22], %70 {strides = array<i32>} : memref<8x32xf32, #tpu.memory_space<vmem>>, vector<1x32xf32>,
    %c3_i32 = arith.constant 3 : i32
    %73 = arith.index_cast %c3_i32 : i32 to index
    %c0_23 = arith.constant 0 : index
    %74 = vector.load %arg7[%73, %c0_23] : memref<8x128xf32, #tpu.memory_space<vmem>>, vector<1x128xf32>
    %cst_24 = arith.constant dense<0.000000e+00> : vector<1x128xf32>
    %75 = tpu.matmul %70, %7, %cst_24 {dimension_numbers = #tpu.dot_dimension_numbers<[1], [0], [0], [1], [0, 0, 1, 1], [], []>} : vector<1x32xf32>, vector<32x128xf32>, vector<1x128xf32> -> vector<1x128xf32>
    %76 = arith.addf %74, %75 : vector<1x128xf32>
    %77 = arith.negf %76 : vector<1x128xf32>
    %78 = math.exp %77 : vector<1x128xf32>
    %cst_25 = arith.constant 1.000000e+00 : f32
    %79 = vector.broadcast %cst_25 : f32 to vector<1x128xf32>
    %80 = arith.addf %79, %78 : vector<1x128xf32>
    %81 = arith.divf %79, %80 : vector<1x128xf32>
    %82 = math.tanh %76 : vector<1x128xf32>
    %83 = vector.extract_strided_slice %81 {offsets = [0, 0], sizes = [1, 32], strides = [1, 1]} : vector<1x128xf32> to vector<1x32xf32>
    %84 = vector.extract_strided_slice %81 {offsets = [0, 32], sizes = [1, 32], strides = [1, 1]} : vector<1x128xf32> to vector<1x32xf32>
    %85 = vector.extract_strided_slice %81 {offsets = [0, 64], sizes = [1, 32], strides = [1, 1]} : vector<1x128xf32> to vector<1x32xf32>
    %86 = vector.extract_strided_slice %82 {offsets = [0, 96], sizes = [1, 32], strides = [1, 1]} : vector<1x128xf32> to vector<1x32xf32>
    %87 = arith.mulf %84, %68 : vector<1x32xf32>
    %88 = arith.mulf %83, %86 : vector<1x32xf32>
    %89 = arith.addf %87, %88 : vector<1x32xf32>
    %90 = math.tanh %89 : vector<1x32xf32>
    %91 = arith.mulf %85, %90 : vector<1x32xf32>
    %92 = arith.index_cast %c3_i32 : i32 to index
    %c0_26 = arith.constant 0 : index
    %93 = vector.load %arg8[%92, %c0_26] : memref<8x32xf32, #tpu.memory_space<vmem>>, vector<1x32xf32>
    tpu.vector_store %arg8[%92, %c0_26], %91 {strides = array<i32>} : memref<8x32xf32, #tpu.memory_space<vmem>>, vector<1x32xf32>,
    %c4_i32 = arith.constant 4 : i32
    %94 = arith.index_cast %c4_i32 : i32 to index
    %c0_27 = arith.constant 0 : index
    %95 = vector.load %arg7[%94, %c0_27] : memref<8x128xf32, #tpu.memory_space<vmem>>, vector<1x128xf32>
    %cst_28 = arith.constant dense<0.000000e+00> : vector<1x128xf32>
    %96 = tpu.matmul %91, %7, %cst_28 {dimension_numbers = #tpu.dot_dimension_numbers<[1], [0], [0], [1], [0, 0, 1, 1], [], []>} : vector<1x32xf32>, vector<32x128xf32>, vector<1x128xf32> -> vector<1x128xf32>
    %97 = arith.addf %95, %96 : vector<1x128xf32>
    %98 = arith.negf %97 : vector<1x128xf32>
    %99 = math.exp %98 : vector<1x128xf32>
    %cst_29 = arith.constant 1.000000e+00 : f32
    %100 = vector.broadcast %cst_29 : f32 to vector<1x128xf32>
    %101 = arith.addf %100, %99 : vector<1x128xf32>
    %102 = arith.divf %100, %101 : vector<1x128xf32>
    %103 = math.tanh %97 : vector<1x128xf32>
    %104 = vector.extract_strided_slice %102 {offsets = [0, 0], sizes = [1, 32], strides = [1, 1]} : vector<1x128xf32> to vector<1x32xf32>
    %105 = vector.extract_strided_slice %102 {offsets = [0, 32], sizes = [1, 32], strides = [1, 1]} : vector<1x128xf32> to vector<1x32xf32>
    %106 = vector.extract_strided_slice %102 {offsets = [0, 64], sizes = [1, 32], strides = [1, 1]} : vector<1x128xf32> to vector<1x32xf32>
    %107 = vector.extract_strided_slice %103 {offsets = [0, 96], sizes = [1, 32], strides = [1, 1]} : vector<1x128xf32> to vector<1x32xf32>
    %108 = arith.mulf %105, %89 : vector<1x32xf32>
    %109 = arith.mulf %104, %107 : vector<1x32xf32>
    %110 = arith.addf %108, %109 : vector<1x32xf32>
    %111 = math.tanh %110 : vector<1x32xf32>
    %112 = arith.mulf %106, %111 : vector<1x32xf32>
    %113 = arith.index_cast %c4_i32 : i32 to index
    %c0_30 = arith.constant 0 : index
    %114 = vector.load %arg8[%113, %c0_30] : memref<8x32xf32, #tpu.memory_space<vmem>>, vector<1x32xf32>
    tpu.vector_store %arg8[%113, %c0_30], %112 {strides = array<i32>} : memref<8x32xf32, #tpu.memory_space<vmem>>, vector<1x32xf32>,
    %c5_i32 = arith.constant 5 : i32
    %115 = arith.index_cast %c5_i32 : i32 to index
    %c0_31 = arith.constant 0 : index
    %116 = vector.load %arg7[%115, %c0_31] : memref<8x128xf32, #tpu.memory_space<vmem>>, vector<1x128xf32>
    %cst_32 = arith.constant dense<0.000000e+00> : vector<1x128xf32>
    %117 = tpu.matmul %112, %7, %cst_32 {dimension_numbers = #tpu.dot_dimension_numbers<[1], [0], [0], [1], [0, 0, 1, 1], [], []>} : vector<1x32xf32>, vector<32x128xf32>, vector<1x128xf32> -> vector<1x128xf32>
    %118 = arith.addf %116, %117 : vector<1x128xf32>
    %119 = arith.negf %118 : vector<1x128xf32>
    %120 = math.exp %119 : vector<1x128xf32>
    %cst_33 = arith.constant 1.000000e+00 : f32
    %121 = vector.broadcast %cst_33 : f32 to vector<1x128xf32>
    %122 = arith.addf %121, %120 : vector<1x128xf32>
    %123 = arith.divf %121, %122 : vector<1x128xf32>
    %124 = math.tanh %118 : vector<1x128xf32>
    %125 = vector.extract_strided_slice %123 {offsets = [0, 0], sizes = [1, 32], strides = [1, 1]} : vector<1x128xf32> to vector<1x32xf32>
    %126 = vector.extract_strided_slice %123 {offsets = [0, 32], sizes = [1, 32], strides = [1, 1]} : vector<1x128xf32> to vector<1x32xf32>
    %127 = vector.extract_strided_slice %123 {offsets = [0, 64], sizes = [1, 32], strides = [1, 1]} : vector<1x128xf32> to vector<1x32xf32>
    %128 = vector.extract_strided_slice %124 {offsets = [0, 96], sizes = [1, 32], strides = [1, 1]} : vector<1x128xf32> to vector<1x32xf32>
    %129 = arith.mulf %126, %110 : vector<1x32xf32>
    %130 = arith.mulf %125, %128 : vector<1x32xf32>
    %131 = arith.addf %129, %130 : vector<1x32xf32>
    %132 = math.tanh %131 : vector<1x32xf32>
    %133 = arith.mulf %127, %132 : vector<1x32xf32>
    %134 = arith.index_cast %c5_i32 : i32 to index
    %c0_34 = arith.constant 0 : index
    %135 = vector.load %arg8[%134, %c0_34] : memref<8x32xf32, #tpu.memory_space<vmem>>, vector<1x32xf32>
    tpu.vector_store %arg8[%134, %c0_34], %133 {strides = array<i32>} : memref<8x32xf32, #tpu.memory_space<vmem>>, vector<1x32xf32>,
    %c6_i32 = arith.constant 6 : i32
    %136 = arith.index_cast %c6_i32 : i32 to index
    %c0_35 = arith.constant 0 : index
    %137 = vector.load %arg7[%136, %c0_35] : memref<8x128xf32, #tpu.memory_space<vmem>>, vector<1x128xf32>
    %cst_36 = arith.constant dense<0.000000e+00> : vector<1x128xf32>
    %138 = tpu.matmul %133, %7, %cst_36 {dimension_numbers = #tpu.dot_dimension_numbers<[1], [0], [0], [1], [0, 0, 1, 1], [], []>} : vector<1x32xf32>, vector<32x128xf32>, vector<1x128xf32> -> vector<1x128xf32>
    %139 = arith.addf %137, %138 : vector<1x128xf32>
    %140 = arith.negf %139 : vector<1x128xf32>
    %141 = math.exp %140 : vector<1x128xf32>
    %cst_37 = arith.constant 1.000000e+00 : f32
    %142 = vector.broadcast %cst_37 : f32 to vector<1x128xf32>
    %143 = arith.addf %142, %141 : vector<1x128xf32>
    %144 = arith.divf %142, %143 : vector<1x128xf32>
    %145 = math.tanh %139 : vector<1x128xf32>
    %146 = vector.extract_strided_slice %144 {offsets = [0, 0], sizes = [1, 32], strides = [1, 1]} : vector<1x128xf32> to vector<1x32xf32>
    %147 = vector.extract_strided_slice %144 {offsets = [0, 32], sizes = [1, 32], strides = [1, 1]} : vector<1x128xf32> to vector<1x32xf32>
    %148 = vector.extract_strided_slice %144 {offsets = [0, 64], sizes = [1, 32], strides = [1, 1]} : vector<1x128xf32> to vector<1x32xf32>
    %149 = vector.extract_strided_slice %145 {offsets = [0, 96], sizes = [1, 32], strides = [1, 1]} : vector<1x128xf32> to vector<1x32xf32>
    %150 = arith.mulf %147, %131 : vector<1x32xf32>
    %151 = arith.mulf %146, %149 : vector<1x32xf32>
    %152 = arith.addf %150, %151 : vector<1x32xf32>
    %153 = math.tanh %152 : vector<1x32xf32>
    %154 = arith.mulf %148, %153 : vector<1x32xf32>
    %155 = arith.index_cast %c6_i32 : i32 to index
    %c0_38 = arith.constant 0 : index
    %156 = vector.load %arg8[%155, %c0_38] : memref<8x32xf32, #tpu.memory_space<vmem>>, vector<1x32xf32>
    tpu.vector_store %arg8[%155, %c0_38], %154 {strides = array<i32>} : memref<8x32xf32, #tpu.memory_space<vmem>>, vector<1x32xf32>,
    %c7_i32 = arith.constant 7 : i32
    %157 = arith.index_cast %c7_i32 : i32 to index
    %c0_39 = arith.constant 0 : index
    %158 = vector.load %arg7[%157, %c0_39] : memref<8x128xf32, #tpu.memory_space<vmem>>, vector<1x128xf32>
    %cst_40 = arith.constant dense<0.000000e+00> : vector<1x128xf32>
    %159 = tpu.matmul %154, %7, %cst_40 {dimension_numbers = #tpu.dot_dimension_numbers<[1], [0], [0], [1], [0, 0, 1, 1], [], []>} : vector<1x32xf32>, vector<32x128xf32>, vector<1x128xf32> -> vector<1x128xf32>
    %160 = arith.addf %158, %159 : vector<1x128xf32>
    %161 = arith.negf %160 : vector<1x128xf32>
    %162 = math.exp %161 : vector<1x128xf32>
    %cst_41 = arith.constant 1.000000e+00 : f32
    %163 = vector.broadcast %cst_41 : f32 to vector<1x128xf32>
    %164 = arith.addf %163, %162 : vector<1x128xf32>
    %165 = arith.divf %163, %164 : vector<1x128xf32>
    %166 = math.tanh %160 : vector<1x128xf32>
    %167 = vector.extract_strided_slice %165 {offsets = [0, 0], sizes = [1, 32], strides = [1, 1]} : vector<1x128xf32> to vector<1x32xf32>
    %168 = vector.extract_strided_slice %165 {offsets = [0, 32], sizes = [1, 32], strides = [1, 1]} : vector<1x128xf32> to vector<1x32xf32>
    %169 = vector.extract_strided_slice %165 {offsets = [0, 64], sizes = [1, 32], strides = [1, 1]} : vector<1x128xf32> to vector<1x32xf32>
    %170 = vector.extract_strided_slice %166 {offsets = [0, 96], sizes = [1, 32], strides = [1, 1]} : vector<1x128xf32> to vector<1x32xf32>
    %171 = arith.mulf %168, %152 : vector<1x32xf32>
    %172 = arith.mulf %167, %170 : vector<1x32xf32>
    %173 = arith.addf %171, %172 : vector<1x32xf32>
    %174 = math.tanh %173 : vector<1x32xf32>
    %175 = arith.mulf %169, %174 : vector<1x32xf32>
    %176 = arith.index_cast %c7_i32 : i32 to index
    %c0_42 = arith.constant 0 : index
    %177 = vector.load %arg8[%176, %c0_42] : memref<8x32xf32, #tpu.memory_space<vmem>>, vector<1x32xf32>
    tpu.vector_store %arg8[%176, %c0_42], %175 {strides = array<i32>} : memref<8x32xf32, #tpu.memory_space<vmem>>, vector<1x32xf32>,
    %c8_i32 = arith.constant 8 : i32
    %c0_43 = arith.constant 0 : index
    %c0_44 = arith.constant 0 : index
    %178 = vector.load %arg4[%c0_43, %c0_44] : memref<1x32xf32, #tpu.memory_space<vmem>>, vector<1x32xf32>
    %c0_45 = arith.constant 0 : index
    %c0_46 = arith.constant 0 : index
    %179 = vector.load %arg8[%c0_45, %c0_46] : memref<8x32xf32, #tpu.memory_space<vmem>>, vector<8x32xf32>
    %180 = tpu.transpose %179, [1, 0] : vector<8x32xf32> -> vector<32x8xf32>
    %cst_47 = arith.constant dense<0.000000e+00> : vector<1x8xf32>
    %181 = tpu.matmul %178, %180, %cst_47 {dimension_numbers = #tpu.dot_dimension_numbers<[1], [0], [0], [1], [0, 0, 1, 1], [], []>} : vector<1x32xf32>, vector<32x8xf32>, vector<1x8xf32> -> vector<1x8xf32>
    %c0_48 = arith.constant 0 : index
    %c0_49 = arith.constant 0 : index
    %182 = vector.load %arg5[%c0_48, %c0_49] : memref<1x1xf32, #tpu.memory_space<vmem>>, vector<1x1xf32>
    %183 = vector.broadcast %182 : vector<1x1xf32> to vector<1x8xf32>
    %184 = arith.addf %181, %183 : vector<1x8xf32>
    %c0_50 = arith.constant 0 : index
    %c0_51 = arith.constant 0 : index
    %185 = vector.load %arg6[%c0_50, %c0_51] : memref<1x8xf32, #tpu.memory_space<vmem>>, vector<1x8xf32>
    tpu.vector_store %arg6[%c0_50, %c0_51], %184 {strides = array<i32>} : memref<1x8xf32, #tpu.memory_space<vmem>>, vector<1x8xf32>,
    return
  }
}

</mosaic_0001>

<bundles_post_ra>
// kernel: tpu_custom_call.1
= control target key start
LH: loop header
LB: loop body
LE: loop exit
PB: predicated region body
PF: predicated region fallthrough
CT: control target
= control target key end

     0   :  { %s1589_s0 = inlined_call_operand.vmem [shape: f32[8,2], index: 0, kind: input, shape index: {}]   ;;  %s1590_s1 = inlined_call_operand.vmem [shape: f32[2,128], index: 1, kind: input, shape index: {}]   ;;  %s1591_s2 = inlined_call_operand.hbm [shape: f32[32,128], index: 2, kind: input, shape index: {}]   ;;  %s1592_s3 = inlined_call_operand.vmem [shape: f32[1,128], index: 3, kind: input, shape index: {}]   ;;  %s1593_s4 = inlined_call_operand.vmem [shape: f32[1,32], index: 4, kind: input, shape index: {}]   ;;  %s1594_s5 = inlined_call_operand.<no memory space> [shape: f32[1,1], index: 5, kind: input, shape index: {}]   ;;  %s1595_s6 = inlined_call_operand.hbm [shape: f32[1,8], index: 6, kind: output, shape index: {}]  }
   0x1   :  { %v11_v0 = vstv %s1594_s5 }
   0x2   :  { %12 = vst [vmem:[#allocation4] sm:$0x1] %v11_v0 }
   0x3   :  { %13 = vsyncpa [#allocation6], 0 }
   0x4   :  { %14 = vsyncpa [#allocation7], 0  ;;  %s1397_s23 = smov [#allocation5]   ;;  %s1349_s27 = scalar_lea.hbm %s1591_s2, 512 }
   0x5   :  { %s24_s24 = sshll.u32 %s1397_s23, 4  ;;  %p1350_p0 = scmp.ne.s32.totalorder %s1591_s2, %s1349_s27  ;;  %s25_s24 = int_to_ptr.vmem [resolvable:$true] %s24_s24 }
   0x6   :  { %p1353_p1 = scmp.lt.u32.totalorder %s1349_s27, %s1591_s2 }
   0x8   :  { %p1355_p2 = pnand %p1353_p1, %p1350_p0 }
   0xa   :  { %1358 = shalt.err (!%p1355_p2)
}
   0xb   :  { %s1359_s5 = scalar_lea.vmem %s25_s24, 512  ;;  %p1364_p4 = scmp.lt.s32.totalorder %s25_s24, %s25_s24 }
   0xc   :  { %p1360_p3 = scmp.ne.s32.totalorder %s25_s24, %s1359_s5  ;;  %p1365_p5 = scmp.lt.s32.totalorder %s1359_s5, %s1359_s5 }
   0xe   :  { %p1366_p6 = por %p1365_p5, %p1364_p4 }
  0x10   :  { %p1367_p7 = pnand %p1366_p6, %p1360_p3 }
  0x12   :  { %1370 = shalt.err (!%p1367_p7)
}
  0x13   :  { %s1398_s8 = smov 128   ;;  %s1399_s9 = smov 8  }
  0x14   :  { %30 = dma.hbm_to_vmem [thread:$0]  %s1591_s2, 512, %s25_s24, [#allocation6], %s1398_s8, %s1398_s8, %s1399_s9  }
  0x15   :  { %1393 = dma.done.wait [#allocation6], 512  }
  0x16   :  { %1394 = vsyncadd [#allocation6], 4294966784  ;;  %v1400_v1 = vmov 0.0   ;;  %vm1401_vm0 = vmmov 0   ;;  %v1402_v2 = vmov 0.0|0.0   ;;  %vm53_vm1 = vcmask 1041408  }
  0x17   :  { %1128 = vmatprep.subr.mxu0 %v1400_v1  ;;  %1130 = vmatprep.mubr.msk.f32.mxu0 %vm1401_vm0, %v1400_v1  ;;  %vm49_vm2 = vcmask 15360   ;;  %v41_v3 = vld [vmem:[%s1590_s1] sm:$0x3]  ;;  %v128_v5 = vld [vmem:[#allocation5] sm:$0xff]  ;;  %v131_v8 = vld [vmem:[#allocation5 + $0x18] sm:$0xff]  ;;  %s1403_s15 = smov 32  }
  0x18   :  { %1226 = vmatprep.subr.bf16.mxu1 %v1402_v2  ;;  %1141 = vmatprep.mubr.msk.f32.mxu1 %vm1401_vm0, %v1400_v1  ;;  %v40_v4 = vld [vmem:[%s1589_s0] sm:$0xff]  ;;  %vm236_vm3 = vcmask 253952   ;;  %vm133_vm4 = vcmask 261120   ;;  %s1406_s18 = smov [#allocation8]   ;;  %vm1047_vm5 = vcmask 57344  }
  0x19   :  { %1129 = vmatpush3.msk.msra.mxu0 %vm53_vm1, %v41_v3  ;;  %v129_v6 = vld [vmem:[#allocation5 + $0x8] sm:$0xff]  ;;  %v130_v7 = vld [vmem:[#allocation5 + $0x10] sm:$0xff]  ;;  %s1055_s19 = sshll.u32 %s1406_s18, 4  ;;  %s1056_s19 = int_to_ptr.vmem [resolvable:$true] %s1055_s19 }
  0x1a   :  { %1131 = vmatmul.mubr.msk.f32.vlgmr.msra.gmra.mrb[0].mxu0 %vm49_vm2, %v40_v4  ;;  %v1469_v9 = vpack.c.bf16 %v129_v6, %v128_v5  ;;  %1232 = vmatprep.subr.bf16.mxu0 %v1402_v2  ;;  %v1475_v10 = vpack.c.bf16 %v131_v8, %v130_v7  ;;  %v1064_v11 = vld [vmem:[%s1592_s3] ss:$0 sm:$0xff]  ;;  %s1404_s3 = smov 64   ;;  %s1371_s20 = scalar_lea.vmem %s1056_s19, 16 }
  0x1b   :  { %1152 = vmatprep.mubr.msk.f32.mxu0 %vm1401_vm0, %v1400_v1  ;;  %p1372_p8 = scmp.ne.s32.totalorder %s1056_s19, %s1371_s20  ;;  %s1375_s21 = scalar_lea.vmem %s1056_s19, 32 }
  0x1c   :  { %1228 = vmatpush3.bf16.msra.mxu1 %v1469_v9  ;;  %1234 = vmatpush3.bf16.msra.mxu0 %v1469_v9  ;;  %p1376_p9 = scmp.lt.s32.totalorder %s1056_s19, %s1056_s19  ;;  %p1377_p10 = scmp.lt.s32.totalorder %s1375_s21, %s1371_s20 }
  0x1d   :  { %1229 = vmatprep.subr.bf16.mxu1 %v1402_v2  ;;  %1235 = vmatprep.subr.bf16.mxu0 %v1402_v2 }
  0x1e   :  { %p1378_p11 = por %p1377_p10, %p1376_p9 }
  0x20   :  { %1231 = vmatpush3.bf16.msra.mxu1 %v1475_v10  ;;  %1237 = vmatpush3.bf16.msra.mxu0 %v1475_v10  ;;  %p1379_p12 = pnand %p1378_p11, %p1372_p8 }
  0x21   :  { %1238 = vmatprep.subr.bf16.mxu1 %v1402_v2  ;;  %1244 = vmatprep.subr.bf16.mxu0 %v1402_v2 }
  0x23   :  { %1142 = vmatmul.mubr.f32.vlgmr.msra.gmra.mrb[0].mxu1 %v1400_v1 }
  0x24   :  { %1240 = vmatpush3.bf16.msra.mxu1 %v1469_v9  ;;  %1163 = vmatprep.mubr.msk.f32.mxu1 %vm1401_vm0, %v1400_v1 }
  0x25   :  { %1241 = vmatprep.subr.bf16.mxu1 %v1402_v2 }
  0x28   :  { %1243 = vmatpush3.bf16.msra.mxu1 %v1475_v10 }
  0x29   :  { %1250 = vmatprep.subr.bf16.mxu1 %v1402_v2 }
  0xed   :  { %v123_v12 = vpop.f32.mrb[0].mxu0 }
  0xee   :  { %v124_v13 = vadd.f32 %v1064_v11, %v123_v12  ;;  %v1132_v14 = vpop.f32.mrb[1].mxu0 }
  0xf0   :  { %127 = vst [vmem:[#allocation2] sm:$0xff] %v124_v13 }
  0xf6   :  { %v203_v15 = vpop.f32.mrb[0].mxu1 }
  0xf7   :  { %v132_v16 = vld [vmem:[#allocation2] sm:$0x1]  ;;  %v1143_v17 = vpop.f32.mrb[1].mxu1  ;;  %v238_v33 = vld [vmem:[#allocation2 + $0x1] sm:$0x1] }
  0xf8   :  { %v207_v18 = vadd.f32 %v203_v15, %v132_v16  ;;  %v341_v51 = vld [vmem:[#allocation2 + $0x2] sm:$0x1]  ;;  %v444_v7 = vld [vmem:[#allocation2 + $0x3] sm:$0x1] }
  0xfa   :  { %1285 = vtanh.f32 %v207_v18  ;;  %v1067_v20 = vmul.f32 -1.442695, %v207_v18 }
  0xfc   :  { %1287 = vpow2.f32 %v1067_v20 }
 0x104   :  { %v1286_v19 = vpop.eup %1285 }
 0x105   :  { %217 = vrot.lane.b32.xlu0 %v1286_v19, %s1403_s15 }
 0x106   :  { %v1288_v21 = vpop.eup %1287 }
 0x107   :  { %v211_v22 = vadd.f32 1.0, %v1288_v21 }
 0x109   :  { %1289 = vrcp.f32 %v211_v22 }
 0x113   :  { %v1290_v23 = vpop.eup %1289 }
 0x114   :  { %v215_v26 = vmul.f32 0.0, %v1290_v23 }
 0x177   :  { %v218_v24 = vpop.permute.xlu0 %217 }
 0x178   :  { %v220_v25 = vmul.f32 %v1290_v23, %v218_v24 }
 0x17a   :  { %222 = vrot.lane.b32.xlu0 %v220_v25, %s1403_s15 }
 0x1ec   :  { %v223_v27 = vpop.permute.xlu0 %222 }
 0x1ed   :  { %v225_v28 = vadd.f32 %v223_v27, %v215_v26  ;;  %v547_v27 = vld [vmem:[#allocation2 + $0x4] sm:$0x1] }
 0x1ef   :  { %1291 = vtanh.f32 %v225_v28 }
 0x1f9   :  { %v1292_v29 = vpop.eup %1291 }
 0x1fa   :  { %228 = vrot.lane.b32.xlu1 %v1292_v29, %s1403_s15 }
 0x26c   :  { %v229_v30 = vpop.permute.xlu1 %228 }
 0x26d   :  { %v231_v31 = vmul.f32 %v1290_v23, %v229_v30 }
 0x26f   :  { %233 = vrot.lane.b32.xlu1 %v231_v31, %s1404_s3 }
 0x2e1   :  { %v234_v32 = vpop.permute.xlu1 %233 }
 0x2e2   :  { %237 = vst.msk [vmem:[#allocation3] sm:$0x1] %vm236_vm3, %v234_v32  ;;  %1153 = vmatmul.mubr.msk.f32.vlgmr.msra.gmra.mrb[2].mxu0 %vm133_vm4, %v234_v32 }
 0x2e3   :  { %1246 = vmatpush3.bf16.msra.mxu0 %v1469_v9  ;;  %1174 = vmatprep.mubr.msk.f32.mxu0 %vm1401_vm0, %v1400_v1 }
 0x2e4   :  { %1247 = vmatprep.subr.bf16.mxu0 %v1402_v2 }
 0x2e7   :  { %1249 = vmatpush3.bf16.msra.mxu0 %v1475_v10 }
 0x2e8   :  { %1256 = vmatprep.subr.bf16.mxu0 %v1402_v2 }
 0x3b5   :  { %v307_v34 = vpop.f32.mrb[2].mxu0 }
 0x3b6   :  { %v311_v35 = vadd.f32 %v307_v34, %v238_v33  ;;  %v1154_v36 = vpop.f32.mrb[3].mxu0 }
 0x3b8   :  { %1293 = vtanh.f32 %v311_v35  ;;  %v1069_v38 = vmul.f32 -1.442695, %v311_v35 }
 0x3ba   :  { %1295 = vpow2.f32 %v1069_v38 }
 0x3c2   :  { %v1294_v37 = vpop.eup %1293 }
 0x3c3   :  { %321 = vrot.lane.b32.xlu0 %v1294_v37, %s1403_s15 }
 0x3c4   :  { %v1296_v39 = vpop.eup %1295 }
 0x3c5   :  { %v315_v40 = vadd.f32 1.0, %v1296_v39 }
 0x3c7   :  { %1297 = vrcp.f32 %v315_v40 }
 0x3d1   :  { %v1298_v41 = vpop.eup %1297 }
 0x3d2   :  { %v319_v44 = vmul.f32 %v1298_v41, %v225_v28 }
 0x435   :  { %v322_v42 = vpop.permute.xlu0 %321 }
 0x436   :  { %v324_v43 = vmul.f32 %v1298_v41, %v322_v42 }
 0x438   :  { %326 = vrot.lane.b32.xlu1 %v324_v43, %s1403_s15 }
 0x4aa   :  { %v327_v45 = vpop.permute.xlu1 %326 }
 0x4ab   :  { %v329_v46 = vadd.f32 %v327_v45, %v319_v44  ;;  %v650_v45 = vld [vmem:[#allocation2 + $0x5] sm:$0x1] }
 0x4ad   :  { %1299 = vtanh.f32 %v329_v46 }
 0x4b7   :  { %v1300_v47 = vpop.eup %1299 }
 0x4b8   :  { %332 = vrot.lane.b32.xlu0 %v1300_v47, %s1403_s15 }
 0x52a   :  { %v333_v48 = vpop.permute.xlu0 %332 }
 0x52b   :  { %v335_v49 = vmul.f32 %v1298_v41, %v333_v48 }
 0x52d   :  { %337 = vrot.lane.b32.xlu1 %v335_v49, %s1404_s3 }
 0x59f   :  { %v338_v50 = vpop.permute.xlu1 %337 }
 0x5a0   :  { %340 = vst.msk [vmem:[#allocation3 + $0x1] sm:$0x1] %vm236_vm3, %v338_v50  ;;  %1164 = vmatmul.mubr.msk.f32.vlgmr.msra.gmra.mrb[2].mxu1 %vm133_vm4, %v338_v50 }
 0x5a1   :  { %1252 = vmatpush3.bf16.msra.mxu1 %v1469_v9  ;;  %1185 = vmatprep.mubr.msk.f32.mxu1 %vm1401_vm0, %v1400_v1 }
 0x5a2   :  { %1253 = vmatprep.subr.bf16.mxu1 %v1402_v2 }
 0x5a5   :  { %1255 = vmatpush3.bf16.msra.mxu1 %v1475_v10 }
 0x5a6   :  { %1262 = vmatprep.subr.bf16.mxu1 %v1402_v2 }
 0x673   :  { %v410_v52 = vpop.f32.mrb[2].mxu1 }
 0x674   :  { %v414_v53 = vadd.f32 %v410_v52, %v341_v51  ;;  %v1165_v54 = vpop.f32.mrb[3].mxu1 }
 0x676   :  { %1301 = vtanh.f32 %v414_v53  ;;  %v1071_v56 = vmul.f32 -1.442695, %v414_v53 }
 0x678   :  { %1303 = vpow2.f32 %v1071_v56 }
 0x680   :  { %v1302_v55 = vpop.eup %1301 }
 0x681   :  { %424 = vrot.lane.b32.xlu0 %v1302_v55, %s1403_s15 }
 0x682   :  { %v1304_v57 = vpop.eup %1303 }
 0x683   :  { %v418_v58 = vadd.f32 1.0, %v1304_v57 }
 0x685   :  { %1305 = vrcp.f32 %v418_v58 }
 0x68f   :  { %v1306_v59 = vpop.eup %1305 }
 0x690   :  { %v422_v62 = vmul.f32 %v1306_v59, %v329_v46 }
 0x6f3   :  { %v425_v60 = vpop.permute.xlu0 %424 }
 0x6f4   :  { %v427_v61 = vmul.f32 %v1306_v59, %v425_v60  ;;  %v753_v60 = vld [vmem:[#allocation2 + $0x6] sm:$0x1] }
 0x6f6   :  { %429 = vrot.lane.b32.xlu1 %v427_v61, %s1403_s15 }
 0x768   :  { %v430_v63 = vpop.permute.xlu1 %429 }
 0x769   :  { %v432_v0 = vadd.f32 %v430_v63, %v422_v62 }
 0x76b   :  { %1307 = vtanh.f32 %v432_v0 }
 0x775   :  { %v1308_v3 = vpop.eup %1307 }
 0x776   :  { %435 = vrot.lane.b32.xlu0 %v1308_v3, %s1403_s15 }
 0x7e8   :  { %v436_v4 = vpop.permute.xlu0 %435 }
 0x7e9   :  { %v438_v5 = vmul.f32 %v1306_v59, %v436_v4 }
 0x7eb   :  { %440 = vrot.lane.b32.xlu1 %v438_v5, %s1404_s3 }
 0x85d   :  { %v441_v6 = vpop.permute.xlu1 %440 }
 0x85e   :  { %443 = vst.msk [vmem:[#allocation3 + $0x2] sm:$0x1] %vm236_vm3, %v441_v6  ;;  %1175 = vmatmul.mubr.msk.f32.vlgmr.msra.gmra.mrb[4].mxu0 %vm133_vm4, %v441_v6 }
 0x85f   :  { %1258 = vmatpush3.bf16.msra.mxu0 %v1469_v9  ;;  %1196 = vmatprep.mubr.msk.f32.mxu0 %vm1401_vm0, %v1400_v1 }
 0x860   :  { %1259 = vmatprep.subr.bf16.mxu0 %v1402_v2 }
 0x863   :  { %1261 = vmatpush3.bf16.msra.mxu0 %v1475_v10 }
 0x864   :  { %1268 = vmatprep.subr.bf16.mxu0 %v1402_v2 }
 0x931   :  { %v513_v8 = vpop.f32.mrb[4].mxu0 }
 0x932   :  { %v517_v11 = vadd.f32 %v513_v8, %v444_v7  ;;  %v1176_v12 = vpop.f32.mrb[5].mxu0 }
 0x934   :  { %1309 = vtanh.f32 %v517_v11  ;;  %v1073_v14 = vmul.f32 -1.442695, %v517_v11 }
 0x936   :  { %1311 = vpow2.f32 %v1073_v14 }
 0x93e   :  { %v1310_v13 = vpop.eup %1309 }
 0x93f   :  { %527 = vrot.lane.b32.xlu0 %v1310_v13, %s1403_s15 }
 0x940   :  { %v1312_v15 = vpop.eup %1311 }
 0x941   :  { %v521_v16 = vadd.f32 1.0, %v1312_v15 }
 0x943   :  { %1313 = vrcp.f32 %v521_v16 }
 0x94d   :  { %v1314_v17 = vpop.eup %1313 }
 0x94e   :  { %v525_v20 = vmul.f32 %v1314_v17, %v432_v0 }
 0x9b1   :  { %v528_v18 = vpop.permute.xlu0 %527 }
 0x9b2   :  { %v530_v19 = vmul.f32 %v1314_v17, %v528_v18 }
 0x9b4   :  { %532 = vrot.lane.b32.xlu1 %v530_v19, %s1403_s15 }
 0xa26   :  { %v533_v21 = vpop.permute.xlu1 %532 }
 0xa27   :  { %v535_v22 = vadd.f32 %v533_v21, %v525_v20 }
 0xa29   :  { %1315 = vtanh.f32 %v535_v22 }
 0xa33   :  { %v1316_v23 = vpop.eup %1315 }
 0xa34   :  { %538 = vrot.lane.b32.xlu0 %v1316_v23, %s1403_s15 }
 0xaa6   :  { %v539_v24 = vpop.permute.xlu0 %538 }
 0xaa7   :  { %v541_v25 = vmul.f32 %v1314_v17, %v539_v24  ;;  %v856_v17 = vld [vmem:[#allocation2 + $0x7] sm:$0x1] }
 0xaa9   :  { %543 = vrot.lane.b32.xlu1 %v541_v25, %s1404_s3 }
 0xb1b   :  { %v544_v26 = vpop.permute.xlu1 %543 }
 0xb1c   :  { %546 = vst.msk [vmem:[#allocation3 + $0x3] sm:$0x1] %vm236_vm3, %v544_v26  ;;  %1186 = vmatmul.mubr.msk.f32.vlgmr.msra.gmra.mrb[4].mxu1 %vm133_vm4, %v544_v26 }
 0xb1d   :  { %1264 = vmatpush3.bf16.msra.mxu1 %v1469_v9  ;;  %1207 = vmatprep.mubr.msk.f32.mxu1 %vm1401_vm0, %v1400_v1 }
 0xb1e   :  { %1265 = vmatprep.subr.bf16.mxu1 %v1402_v2 }
 0xb21   :  { %1267 = vmatpush3.bf16.msra.mxu1 %v1475_v10 }
 0xb22   :  { %1221 = vmatprep.subr.mxu1 %v1400_v1 }
 0xbef   :  { %v616_v28 = vpop.f32.mrb[4].mxu1 }
 0xbf0   :  { %v620_v29 = vadd.f32 %v616_v28, %v547_v27  ;;  %v1187_v30 = vpop.f32.mrb[5].mxu1 }
 0xbf2   :  { %1317 = vtanh.f32 %v620_v29  ;;  %v1075_v32 = vmul.f32 -1.442695, %v620_v29 }
 0xbf4   :  { %1319 = vpow2.f32 %v1075_v32 }
 0xbfc   :  { %v1318_v31 = vpop.eup %1317 }
 0xbfd   :  { %630 = vrot.lane.b32.xlu0 %v1318_v31, %s1403_s15 }
 0xbfe   :  { %v1320_v33 = vpop.eup %1319 }
 0xbff   :  { %v624_v34 = vadd.f32 1.0, %v1320_v33 }
 0xc01   :  { %1321 = vrcp.f32 %v624_v34  ;;  %v961_v34 = vld [vmem:[#allocation4] sm:$0x1] }
 0xc0b   :  { %v1322_v35 = vpop.eup %1321 }
 0xc0c   :  { %v628_v38 = vmul.f32 %v1322_v35, %v535_v22 }
 0xc6f   :  { %v631_v36 = vpop.permute.xlu0 %630 }
 0xc70   :  { %v633_v37 = vmul.f32 %v1322_v35, %v631_v36 }
 0xc72   :  { %635 = vrot.lane.b32.xlu1 %v633_v37, %s1403_s15 }
 0xce4   :  { %v636_v39 = vpop.permute.xlu1 %635 }
 0xce5   :  { %v638_v40 = vadd.f32 %v636_v39, %v628_v38  ;;  %v959_v38 = vld [vmem:[%s1593_s4] sm:$0x1]  ;;  %v967_v39 = vlaneseq }
 0xce7   :  { %1323 = vtanh.f32 %v638_v40 }
 0xcf1   :  { %v1324_v41 = vpop.eup %1323 }
 0xcf2   :  { %641 = vrot.lane.b32.xlu0 %v1324_v41, %s1403_s15 }
 0xd64   :  { %v642_v42 = vpop.permute.xlu0 %641 }
 0xd65   :  { %v644_v43 = vmul.f32 %v1322_v35, %v642_v42  ;;  %v1405_v35 = vmov 0  }
 0xd66   :  { %1284 = vset.pattern.permute.xlu0 %v1405_v35 }
 0xd67   :  { %646 = vrot.lane.b32.xlu1 %v644_v43, %s1404_s3 }
 0xdd9   :  { %v647_v44 = vpop.permute.xlu1 %646 }
 0xdda   :  { %649 = vst.msk [vmem:[#allocation3 + $0x4] sm:$0x1] %vm236_vm3, %v647_v44  ;;  %1197 = vmatmul.mubr.msk.f32.vlgmr.msra.gmra.mrb[6].mxu0 %vm133_vm4, %v647_v44 }
 0xddb   :  { %1270 = vmatpush3.bf16.msra.mxu0 %v1469_v9  ;;  %1218 = vmatprep.mubr.msk.f32.mxu0 %vm1401_vm0, %v1400_v1 }
 0xddc   :  { %1271 = vmatprep.subr.bf16.mxu0 %v1402_v2 }
 0xddf   :  { %1273 = vmatpush3.bf16.msra.mxu0 %v1475_v10 }
 0xead   :  { %v719_v46 = vpop.f32.mrb[6].mxu0 }
 0xeae   :  { %v723_v47 = vadd.f32 %v719_v46, %v650_v45  ;;  %v1198_v48 = vpop.f32.mrb[7].mxu0 }
 0xeb0   :  { %1325 = vtanh.f32 %v723_v47  ;;  %v1077_v50 = vmul.f32 -1.442695, %v723_v47 }
 0xeb2   :  { %1327 = vpow2.f32 %v1077_v50 }
 0xeba   :  { %v1326_v49 = vpop.eup %1325 }
 0xebb   :  { %733 = vrot.lane.b32.xlu0 %v1326_v49, %s1403_s15 }
 0xebc   :  { %v1328_v51 = vpop.eup %1327 }
 0xebd   :  { %v727_v52 = vadd.f32 1.0, %v1328_v51 }
 0xebf   :  { %1329 = vrcp.f32 %v727_v52 }
 0xec9   :  { %v1330_v9 = vpop.eup %1329 }
 0xeca   :  { %v731_v2 = vmul.f32 %v1330_v9, %v638_v40  ;;  %v968_v40 = vshrl.u32 %v967_v39, 7 }
 0xecc   :  { %v969_v41 = vsub.s32 0, %v968_v40 }
 0xf2d   :  { %v734_v53 = vpop.permute.xlu0 %733 }
 0xf2e   :  { %v736_v54 = vmul.f32 %v1330_v9, %v734_v53 }
 0xf30   :  { %738 = vrot.lane.b32.xlu1 %v736_v54, %s1403_s15 }
 0xfa2   :  { %v739_v10 = vpop.permute.xlu1 %738 }
 0xfa3   :  { %v741_v55 = vadd.f32 %v739_v10, %v731_v2 }
 0xfa5   :  { %1331 = vtanh.f32 %v741_v55 }
 0xfaf   :  { %v1332_v56 = vpop.eup %1331 }
 0xfb0   :  { %744 = vrot.lane.b32.xlu0 %v1332_v56, %s1403_s15 }
0x1022   :  { %v745_v57 = vpop.permute.xlu0 %744 }
0x1023   :  { %v747_v58 = vmul.f32 %v1330_v9, %v745_v57 }
0x1025   :  { %749 = vrot.lane.b32.xlu1 %v747_v58, %s1404_s3 }
0x1097   :  { %v750_v59 = vpop.permute.xlu1 %749 }
0x1098   :  { %752 = vst.msk [vmem:[#allocation3 + $0x5] sm:$0x1] %vm236_vm3, %v750_v59  ;;  %1208 = vmatmul.mubr.msk.f32.vlgmr.msra.gmra.mrb[6].mxu1 %vm133_vm4, %v750_v59 }
0x1099   :  { %1223 = vmatprep.mubr.msk.f32.mxu1 %vm1401_vm0, %v1400_v1 }
0x116b   :  { %v822_v61 = vpop.f32.mrb[6].mxu1 }
0x116c   :  { %v826_v62 = vadd.f32 %v822_v61, %v753_v60  ;;  %v1209_v63 = vpop.f32.mrb[7].mxu1 }
0x116e   :  { %1333 = vtanh.f32 %v826_v62  ;;  %v1079_v3 = vmul.f32 -1.442695, %v826_v62 }
0x1170   :  { %1335 = vpow2.f32 %v1079_v3 }
0x1178   :  { %v1334_v0 = vpop.eup %1333 }
0x1179   :  { %836 = vrot.lane.b32.xlu0 %v1334_v0, %s1403_s15 }
0x117a   :  { %v1336_v4 = vpop.eup %1335 }
0x117b   :  { %v830_v5 = vadd.f32 1.0, %v1336_v4 }
0x117d   :  { %1337 = vrcp.f32 %v830_v5 }
0x1187   :  { %v1338_v6 = vpop.eup %1337 }
0x1188   :  { %v834_v11 = vmul.f32 %v1338_v6, %v741_v55 }
0x11eb   :  { %v837_v7 = vpop.permute.xlu0 %836 }
0x11ec   :  { %v839_v8 = vmul.f32 %v1338_v6, %v837_v7 }
0x11ee   :  { %841 = vrot.lane.b32.xlu1 %v839_v8, %s1403_s15 }
0x1260   :  { %v842_v1 = vpop.permute.xlu1 %841 }
0x1261   :  { %v844_v12 = vadd.f32 %v842_v1, %v834_v11 }
0x1263   :  { %1339 = vtanh.f32 %v844_v12 }
0x126d   :  { %v1340_v13 = vpop.eup %1339 }
0x126e   :  { %847 = vrot.lane.b32.xlu0 %v1340_v13, %s1403_s15 }
0x12e0   :  { %v848_v14 = vpop.permute.xlu0 %847 }
0x12e1   :  { %v850_v15 = vmul.f32 %v1338_v6, %v848_v14 }
0x12e3   :  { %852 = vrot.lane.b32.xlu1 %v850_v15, %s1404_s3 }
0x1355   :  { %v853_v16 = vpop.permute.xlu1 %852 }
0x1356   :  { %855 = vst.msk [vmem:[#allocation3 + $0x6] sm:$0x1] %vm236_vm3, %v853_v16  ;;  %1219 = vmatmul.mubr.msk.f32.vlgmr.msra.gmra.mrb[8].mxu0 %vm133_vm4, %v853_v16 }
0x1429   :  { %v925_v18 = vpop.f32.mrb[8].mxu0 }
0x142a   :  { %v929_v19 = vadd.f32 %v925_v18, %v856_v17  ;;  %v1220_v20 = vpop.f32.mrb[9].mxu0 }
0x142c   :  { %1341 = vtanh.f32 %v929_v19  ;;  %v1081_v22 = vmul.f32 -1.442695, %v929_v19 }
0x142e   :  { %1343 = vpow2.f32 %v1081_v22 }
0x1436   :  { %v1342_v21 = vpop.eup %1341 }
0x1437   :  { %939 = vrot.lane.b32.xlu0 %v1342_v21, %s1403_s15 }
0x1438   :  { %v1344_v23 = vpop.eup %1343 }
0x1439   :  { %v933_v24 = vadd.f32 1.0, %v1344_v23 }
0x143b   :  { %1345 = vrcp.f32 %v933_v24 }
0x1445   :  { %v1346_v25 = vpop.eup %1345 }
0x1446   :  { %v937_v28 = vmul.f32 %v1346_v25, %v844_v12 }
0x14a9   :  { %v940_v26 = vpop.permute.xlu0 %939 }
0x14aa   :  { %v942_v27 = vmul.f32 %v1346_v25, %v940_v26 }
0x14ac   :  { %944 = vrot.lane.b32.xlu1 %v942_v27, %s1403_s15 }
0x151e   :  { %v945_v29 = vpop.permute.xlu1 %944 }
0x151f   :  { %v947_v30 = vadd.f32 %v945_v29, %v937_v28 }
0x1521   :  { %1347 = vtanh.f32 %v947_v30 }
0x152b   :  { %v1348_v31 = vpop.eup %1347 }
0x152c   :  { %950 = vrot.lane.b32.xlu0 %v1348_v31, %s1403_s15 }
0x1530   :  { %964 = vperm.xlu0 %1284, %v961_v34  }
0x159e   :  { %v951_v32 = vpop.permute.xlu0 %950 }
0x159f   :  { %v953_v33 = vmul.f32 %v1346_v25, %v951_v32 }
0x15a1   :  { %955 = vrot.lane.b32.xlu1 %v953_v33, %s1404_s3 }
0x15af   :  { %v965_v42 = vpop.permute.xlu0 %964 }
0x15b0   :  { %v970_v43 = vrot.slane %v965_v42, %v969_v41 }
0x1613   :  { %v956_v36 = vpop.permute.xlu1 %955 }
0x1614   :  { %958 = vst.msk [vmem:[#allocation3 + $0x7] sm:$0x1] %vm236_vm3, %v956_v36 }
0x161b   :  { %v960_v37 = vld [vmem:[#allocation3] sm:$0xff] }
0x161c   :  { %1222 = vmatpush3.xpose.msk.msra.mxu1 %vm133_vm4, %v960_v37 }
0x161f   :  { %1224 = vmatmul.mubr.msk.f32.vlgmr.msra.gmra.mrb[8].mxu1 %vm133_vm4, %v959_v38 }
0x16f2   :  { %v1043_v44 = vpop.f32.mrb[8].mxu1 }
0x16f3   :  { %v1044_v45 = vadd.f32 %v1043_v44, %v970_v43  ;;  %v1225_v46 = vpop.f32.mrb[9].mxu1 }
0x16f5   :  { %1048 = vst.msk [vmem:[#allocation8] sm:$0x1] %vm1047_vm5, %v1044_v45 }
0x16f6   :  { %1382 = shalt.err (!%p1379_p12)
}
0x16f7   :  { %s1383_s23 = scalar_lea.hbm %s1595_s6, 16 }
0x16f8   :  { %p1384_p13 = scmp.ne.s32.totalorder %s1595_s6, %s1383_s23  ;;  %p1387_p0 = scmp.lt.u32.totalorder %s1383_s23, %s1595_s6 }
0x16fa   :  { %p1389_p1 = pnand %p1387_p0, %p1384_p13 }
0x16fc   :  { %1392 = shalt.err (!%p1389_p1)
}
0x16fd   :  { %1058 = dma.vmem_to_hbm [thread:$0]  %s1056_s19, 16, %s1595_s6, [#allocation7]  }
0x16fe   :  { %1395 = dma.done.wait [#allocation7], 16  }
0x16ff   :  { %1396 = vsyncadd [#allocation7], 4294967280 }
0x1700   :  { %1062 = vsyncpa [#allocation6], 1 }
0x1701   :  { %1063 = vsyncpa [#allocation7], 1 }

</bundles_post_ra>
